<compile_context>
chip_gen: v6e
topology: v6e:2x2x1
jax: 0.10.0
libtpu: 0.0.40
codegen_flags: <defaults>
</compile_context>

<pallas_src>
import jax
import jax.numpy as jnp
from jax import lax
from jax.experimental import pallas as pl
from jax.experimental.pallas import tpu as pltpu

EPS = 1e-5
PAD_ROWS = 8  # sublane-aligned top padding inside the conv scratch


# ---------------------------------------------------------------------------
# Banded weight construction (wrapper-side, tiny): M[kh, w'*Cin+ci, w*Cout+co]
# = W[kh, w'-w+1, ci, co] when |w'-w| <= 1, else 0.  Contracting an H-padded
# input row slab (H, W*Cin) with M[kh] yields the lane-dense conv output
# (H, W*Cout) directly, with width padding handled implicitly.
# ---------------------------------------------------------------------------
def _build_banded_weights(w_hwio, W):
    KH, KW, Cin, Cout = w_hwio.shape
    m = jnp.zeros((KH, W, Cin, W, Cout), w_hwio.dtype)
    for kw in range(KW):
        lo = max(0, 1 - kw)           # smallest output w with a valid source col
        hi = min(W, W + 1 - kw)       # one past largest valid output w
        w_out = jnp.arange(lo, hi)
        w_src = w_out + (kw - 1)
        val = jnp.broadcast_to(w_hwio[:, kw][None, :, :, :],
                               (hi - lo, KH, Cin, Cout))
        m = m.at[:, w_src, :, w_out, :].set(val)
    return m.reshape(KH, W * Cin, W * Cout)


# ---------------------------------------------------------------------------
# Kernel 1: 3x3 "same" conv (+ bias) for one batch element, lane-dense output,
# plus per-batch partial BN statistics (sum / sum of squares over H).
# ---------------------------------------------------------------------------
def _make_conv_kernel(H, W, Cin, Cout, pad_rows):
    def conv3x3_kernel(x_ref, m_ref, b_ref, o_ref, sum_ref, sq_ref, xpad_ref):
        # x_ref:   (1, H, W*Cin)            unpadded input rows (lane-dense)
        # m_ref:   (3, W*Cin, W*Cout)       banded weights
        # b_ref:   (1, W*Cout)              conv bias tiled across W
        # o_ref:   (1, H, W*Cout)           conv output (lane-dense)
        # sum_ref: (1, 1, W*Cout)           partial sum over H (per batch elem)
        # sq_ref:  (1, 1, W*Cout)           partial sum of squares over H
        # xpad_ref: VMEM scratch (2*pad_rows + H, W*Cin), zero-bordered

        # Zero border + aligned interior store (halo handled in VMEM, no HBM pad).
        xpad_ref[...] = jnp.zeros_like(xpad_ref)
        xpad_ref[pad_rows:pad_rows + H, :] = x_ref[0]

        acc = jnp.zeros((H, W * Cout), jnp.float32)
        for kh in range(3):
            start = pad_rows - 1 + kh
            lhs = xpad_ref[start:start + H, :]            # (H, W*Cin) ref slice
            acc = acc + jnp.dot(lhs, m_ref[kh],
                                preferred_element_type=jnp.float32)
        acc = acc + b_ref[...]                            # broadcast over H

        o_ref[0] = acc.astype(o_ref.dtype)                # unmasked 128-lane store
        sum_ref[0] = jnp.sum(acc, axis=0, keepdims=True)
        sq_ref[0] = jnp.sum(acc * acc, axis=0, keepdims=True)

    return conv3x3_kernel


# ---------------------------------------------------------------------------
# Kernel 2: normalize (precomputed per-lane scale/shift) + ReLU, tiled over
# row blocks of the lane-dense (B*H, W*Cout) slab.
# ---------------------------------------------------------------------------
def bn_relu_kernel(y_ref, scale_ref, shift_ref, o_ref):
    y = y_ref[...]
    out = y * scale_ref[...] + shift_ref[...]
    o_ref[...] = jnp.maximum(out, 0.0).astype(o_ref.dtype)


def _row_tile(rows):
    for t in (512, 256, 128, 64, 32, 16, 8):
        if rows % t == 0 and rows // t >= 2:
            return t
    return rows


def single_conv_forward(x_nchw, w_oihw, b_conv, gamma, beta):
    """Forward pass matching PyTorch single_conv (module in default train mode)."""
    B, Cin, H, W = x_nchw.shape
    Cout = w_oihw.shape[0]
    NL = W * Cout  # lane width of all conv/BN blocks

    # NCHW -> (B, H, W*Cin) lane-dense rows (no HBM-level spatial padding).
    x_rows = jnp.transpose(x_nchw, (0, 2, 3, 1)).reshape(B, H, W * Cin)
    # OIHW -> HWIO -> banded (3, W*Cin, W*Cout) weights.
    w_hwio = jnp.transpose(w_oihw, (2, 3, 1, 0))
    m_band = _build_banded_weights(w_hwio, W)
    b_lane = jnp.tile(b_conv, W).reshape(1, NL)

    conv_kernel = _make_conv_kernel(H, W, Cin, Cout, PAD_ROWS)

    conv_out, psum, psq = pl.pallas_call(
        conv_kernel,
        out_shape=(
            jax.ShapeDtypeStruct((B, H, NL), jnp.float32),
            jax.ShapeDtypeStruct((B, 1, NL), jnp.float32),
            jax.ShapeDtypeStruct((B, 1, NL), jnp.float32),
        ),
        grid_spec=pltpu.PrefetchScalarGridSpec(
            num_scalar_prefetch=0,
            grid=(B,),
            in_specs=[
                pl.BlockSpec((1, H, W * Cin), lambda b: (b, 0, 0)),
                pl.BlockSpec((3, W * Cin, NL), lambda b: (0, 0, 0)),
                pl.BlockSpec((1, NL), lambda b: (0, 0)),
            ],
            out_specs=[
                pl.BlockSpec((1, H, NL), lambda b: (b, 0, 0)),
                pl.BlockSpec((1, 1, NL), lambda b: (b, 0, 0)),
                pl.BlockSpec((1, 1, NL), lambda b: (b, 0, 0)),
            ],
            scratch_shapes=[
                pltpu.VMEM((2 * PAD_ROWS + H, W * Cin), jnp.float32),
            ],
        ),
        compiler_params=pltpu.CompilerParams(
            dimension_semantics=("parallel",),
            vmem_limit_bytes=32 * 1024 * 1024,
        ),
    )(x_rows, m_band, b_lane)

    # Finalize BN batch statistics (tiny per-channel reduction) and fold
    # gamma/beta into per-lane scale/shift for the tiled normalize kernel.
    n_elems = B * H * W
    ch_sum = jnp.sum(psum.reshape(B, W, Cout), axis=(0, 1))
    ch_sq = jnp.sum(psq.reshape(B, W, Cout), axis=(0, 1))
    mean = ch_sum / n_elems
    var = jnp.maximum(ch_sq / n_elems - mean * mean, 0.0)   # biased (train-mode)
    scale = gamma * lax.rsqrt(var + EPS)
    shift = beta - mean * scale
    scale_lane = jnp.tile(scale, W).reshape(1, NL)
    shift_lane = jnp.tile(shift, W).reshape(1, NL)

    # Tiled, lane-dense normalize + ReLU over row blocks.
    rows = B * H
    tr = _row_tile(rows)
    y2d = conv_out.reshape(rows, NL)
    out2d = pl.pallas_call(
        bn_relu_kernel,
        out_shape=jax.ShapeDtypeStruct((rows, NL), jnp.float32),
        grid_spec=pltpu.PrefetchScalarGridSpec(
            num_scalar_prefetch=0,
            grid=(rows // tr,),
            in_specs=[
                pl.BlockSpec((tr, NL), lambda i: (i, 0)),
                pl.BlockSpec((1, NL), lambda i: (0, 0)),
                pl.BlockSpec((1, NL), lambda i: (0, 0)),
            ],
            out_specs=pl.BlockSpec((tr, NL), lambda i: (i, 0)),
        ),
        compiler_params=pltpu.CompilerParams(
            dimension_semantics=("parallel",),
            vmem_limit_bytes=32 * 1024 * 1024,
        ),
    )(y2d, scale_lane, shift_lane)

    out_nhwc = out2d.reshape(B, H, W, Cout)
    return jnp.transpose(out_nhwc, (0, 3, 1, 2))  # back to NCHW


def reference_forward(x_nchw, w_oihw, b_conv, gamma, beta):
    """Plain-JAX reference with identical semantics (for verification)."""
    y = lax.conv_general_dilated(
        x_nchw, w_oihw, window_strides=(1, 1), padding=((1, 1), (1, 1)),
        dimension_numbers=("NCHW", "OIHW", "NCHW"))
    y = y + b_conv.reshape(1, -1, 1, 1)
    mean = jnp.mean(y, axis=(0, 2, 3), keepdims=True)
    var = jnp.mean((y - mean) ** 2, axis=(0, 2, 3), keepdims=True)
    y = (y - mean) * lax.rsqrt(var + EPS)
    y = y * gamma.reshape(1, -1, 1, 1) + beta.reshape(1, -1, 1, 1)
    return jnp.maximum(y, 0.0)


if __name__ == "__main__":
    B, Cin, Cout, H, W = 2, 4, 8, 16, 16

    key = jax.random.PRNGKey(0)
    kx, kw, kb = jax.random.split(key, 3)

    x = jax.random.normal(kx, (B, Cin, H, W), dtype=jnp.float32)
    # Conv2d params (synthetic init), PyTorch shape (Cout, Cin, 3, 3)
    w = jax.random.normal(kw, (Cout, Cin, 3, 3), dtype=jnp.float32) * 0.1
    b = jax.random.normal(kb, (Cout,), dtype=jnp.float32) * 0.1
    # BatchNorm2d affine params: PyTorch default init (weight=1, bias=0)
    gamma = jnp.ones((Cout,), dtype=jnp.float32)
    beta = jnp.zeros((Cout,), dtype=jnp.float32)

    out = single_conv_forward(x, w, b, gamma, beta)
    out = jax.block_until_ready(out)

    ref = reference_forward(x, w, b, gamma, beta)
    assert out.shape == (B, Cout, H, W)
    assert jnp.allclose(out, ref, atol=1e-4, rtol=1e-4), "mismatch vs reference"

    print("KERNEL_OK")
</pallas_src>

<mosaic_0001>
module attributes {stable_mosaic.version = 11 : i64} {
  func.func @conv3x3_kernel(%arg0: i32, %arg1: memref<1x16x64xf32, #tpu.memory_space<vmem>>, %arg2: memref<3x64x128xf32, #tpu.memory_space<vmem>>, %arg3: memref<1x128xf32, #tpu.memory_space<vmem>>, %arg4: memref<1x16x128xf32, #tpu.memory_space<vmem>>, %arg5: memref<1x1x128xf32, #tpu.memory_space<vmem>>, %arg6: memref<1x1x128xf32, #tpu.memory_space<vmem>>, %arg7: memref<32x64xf32, #tpu.memory_space<vmem>>) attributes {dimension_semantics = [#tpu.dimension_semantics<parallel>], iteration_bounds = array<i64: 2>, scalar_prefetch = 0 : i64, scratch_operands = 1 : i64, tpu.core_type = #tpu.core_type<tc>, window_params = [{transform_indices = @transform_0, window_bounds = array<i64: 1, 16, 64>}, {pipeline_mode = #tpu.pipeline_mode<synchronous>, transform_indices = @transform_1, window_bounds = array<i64: 3, 64, 128>}, {pipeline_mode = #tpu.pipeline_mode<synchronous>, transform_indices = @transform_2, window_bounds = array<i64: 1, 128>}, {transform_indices = @transform_3, window_bounds = array<i64: 1, 16, 128>}, {transform_indices = @transform_4, window_bounds = array<i64: 1, 1, 128>}, {transform_indices = @transform_5, window_bounds = array<i64: 1, 1, 128>}]} {
    %cst = arith.constant 0.000000e+00 : f32
    %0 = vector.broadcast %cst : f32 to vector<32x64xf32>
    %c0 = arith.constant 0 : index
    %c0_0 = arith.constant 0 : index
    %1 = vector.load %arg7[%c0, %c0_0] : memref<32x64xf32, #tpu.memory_space<vmem>>, vector<32x64xf32>
    tpu.vector_store %arg7[%c0, %c0_0], %0 {strides = array<i32>} : memref<32x64xf32, #tpu.memory_space<vmem>>, vector<32x64xf32>,
    %c0_1 = arith.constant 0 : index
    %c0_2 = arith.constant 0 : index
    %c0_3 = arith.constant 0 : index
    %2 = vector.load %arg1[%c0_1, %c0_2, %c0_3] : memref<1x16x64xf32, #tpu.memory_space<vmem>>, vector<1x16x64xf32>
    %3 = vector.shape_cast %2 : vector<1x16x64xf32> to vector<16x64xf32>
    %c8 = arith.constant 8 : index
    %c0_4 = arith.constant 0 : index
    %4 = vector.load %arg7[%c8, %c0_4] : memref<32x64xf32, #tpu.memory_space<vmem>>, vector<16x64xf32>
    tpu.vector_store %arg7[%c8, %c0_4], %3 {strides = array<i32>} : memref<32x64xf32, #tpu.memory_space<vmem>>, vector<16x64xf32>,
    %cst_5 = arith.constant 0.000000e+00 : f32
    %5 = vector.broadcast %cst_5 : f32 to vector<16x128xf32>
    %c7 = arith.constant 7 : index
    %c0_6 = arith.constant 0 : index
    %6 = vector.load %arg7[%c7, %c0_6] : memref<32x64xf32, #tpu.memory_space<vmem>>, vector<16x64xf32>
    %c0_7 = arith.constant 0 : index
    %c0_8 = arith.constant 0 : index
    %c0_9 = arith.constant 0 : index
    %7 = vector.load %arg2[%c0_7, %c0_8, %c0_9] : memref<3x64x128xf32, #tpu.memory_space<vmem>>, vector<1x64x128xf32>
    %8 = vector.shape_cast %7 : vector<1x64x128xf32> to vector<64x128xf32>
    %cst_10 = arith.constant dense<0.000000e+00> : vector<16x128xf32>
    %9 = tpu.matmul %6, %8, %cst_10 {dimension_numbers = #tpu.dot_dimension_numbers<[1], [0], [0], [1], [0, 0, 1, 1], [], []>} : vector<16x64xf32>, vector<64x128xf32>, vector<16x128xf32> -> vector<16x128xf32>
    %10 = arith.addf %5, %9 : vector<16x128xf32>
    %c8_11 = arith.constant 8 : index
    %c0_12 = arith.constant 0 : index
    %11 = vector.load %arg7[%c8_11, %c0_12] : memref<32x64xf32, #tpu.memory_space<vmem>>, vector<16x64xf32>
    %c1 = arith.constant 1 : index
    %c0_13 = arith.constant 0 : index
    %c0_14 = arith.constant 0 : index
    %12 = vector.load %arg2[%c1, %c0_13, %c0_14] : memref<3x64x128xf32, #tpu.memory_space<vmem>>, vector<1x64x128xf32>
    %13 = vector.shape_cast %12 : vector<1x64x128xf32> to vector<64x128xf32>
    %cst_15 = arith.constant dense<0.000000e+00> : vector<16x128xf32>
    %14 = tpu.matmul %11, %13, %cst_15 {dimension_numbers = #tpu.dot_dimension_numbers<[1], [0], [0], [1], [0, 0, 1, 1], [], []>} : vector<16x64xf32>, vector<64x128xf32>, vector<16x128xf32> -> vector<16x128xf32>
    %15 = arith.addf %10, %14 : vector<16x128xf32>
    %c9 = arith.constant 9 : index
    %c0_16 = arith.constant 0 : index
    %16 = vector.load %arg7[%c9, %c0_16] : memref<32x64xf32, #tpu.memory_space<vmem>>, vector<16x64xf32>
    %c2 = arith.constant 2 : index
    %c0_17 = arith.constant 0 : index
    %c0_18 = arith.constant 0 : index
    %17 = vector.load %arg2[%c2, %c0_17, %c0_18] : memref<3x64x128xf32, #tpu.memory_space<vmem>>, vector<1x64x128xf32>
    %18 = vector.shape_cast %17 : vector<1x64x128xf32> to vector<64x128xf32>
    %cst_19 = arith.constant dense<0.000000e+00> : vector<16x128xf32>
    %19 = tpu.matmul %16, %18, %cst_19 {dimension_numbers = #tpu.dot_dimension_numbers<[1], [0], [0], [1], [0, 0, 1, 1], [], []>} : vector<16x64xf32>, vector<64x128xf32>, vector<16x128xf32> -> vector<16x128xf32>
    %20 = arith.addf %15, %19 : vector<16x128xf32>
    %c0_20 = arith.constant 0 : index
    %c0_21 = arith.constant 0 : index
    %21 = vector.load %arg3[%c0_20, %c0_21] : memref<1x128xf32, #tpu.memory_space<vmem>>, vector<1x128xf32>
    %22 = vector.broadcast %21 : vector<1x128xf32> to vector<16x128xf32>
    %23 = arith.addf %20, %22 : vector<16x128xf32>
    %c0_22 = arith.constant 0 : index
    %c0_23 = arith.constant 0 : index
    %c0_24 = arith.constant 0 : index
    %24 = vector.load %arg4[%c0_22, %c0_23, %c0_24] : memref<1x16x128xf32, #tpu.memory_space<vmem>>, vector<1x16x128xf32>
    %25 = vector.shape_cast %24 : vector<1x16x128xf32> to vector<16x128xf32>
    %26 = vector.shape_cast %23 : vector<16x128xf32> to vector<1x16x128xf32>
    tpu.vector_store %arg4[%c0_22, %c0_23, %c0_24], %26 {strides = array<i32>} : memref<1x16x128xf32, #tpu.memory_space<vmem>>, vector<1x16x128xf32>,
    %cst_25 = arith.constant dense<0.000000e+00> : vector<128xf32>
    %27 = vector.multi_reduction <add>, %23, %cst_25 [0] : vector<16x128xf32> to vector<128xf32>
    %28 = vector.shape_cast %27 : vector<128xf32> to vector<1x128xf32>
    %c0_26 = arith.constant 0 : index
    %c0_27 = arith.constant 0 : index
    %c0_28 = arith.constant 0 : index
    %29 = vector.load %arg5[%c0_26, %c0_27, %c0_28] : memref<1x1x128xf32, #tpu.memory_space<vmem>>, vector<1x1x128xf32>
    %30 = vector.shape_cast %29 : vector<1x1x128xf32> to vector<1x128xf32>
    %31 = vector.shape_cast %28 : vector<1x128xf32> to vector<1x1x128xf32>
    tpu.vector_store %arg5[%c0_26, %c0_27, %c0_28], %31 {strides = array<i32>} : memref<1x1x128xf32, #tpu.memory_space<vmem>>, vector<1x1x128xf32>,
    %32 = arith.mulf %23, %23 : vector<16x128xf32>
    %cst_29 = arith.constant dense<0.000000e+00> : vector<128xf32>
    %33 = vector.multi_reduction <add>, %32, %cst_29 [0] : vector<16x128xf32> to vector<128xf32>
    %34 = vector.shape_cast %33 : vector<128xf32> to vector<1x128xf32>
    %c0_30 = arith.constant 0 : index
    %c0_31 = arith.constant 0 : index
    %c0_32 = arith.constant 0 : index
    %35 = vector.load %arg6[%c0_30, %c0_31, %c0_32] : memref<1x1x128xf32, #tpu.memory_space<vmem>>, vector<1x1x128xf32>
    %36 = vector.shape_cast %35 : vector<1x1x128xf32> to vector<1x128xf32>
    %37 = vector.shape_cast %34 : vector<1x128xf32> to vector<1x1x128xf32>
    tpu.vector_store %arg6[%c0_30, %c0_31, %c0_32], %37 {strides = array<i32>} : memref<1x1x128xf32, #tpu.memory_space<vmem>>, vector<1x1x128xf32>,
    return
  }
  func.func @transform_0(%arg0: i32) -> (i32, i32, i32) {
    %c0_i32 = arith.constant 0 : i32
    %c0_i32_0 = arith.constant 0 : i32
    %c0_i32_1 = arith.constant 0 : i32
    return %arg0, %c0_i32, %c0_i32_0 : i32, i32, i32
  }
  func.func @transform_1(%arg0: i32) -> (i32, i32, i32) {
    %c0_i32 = arith.constant 0 : i32
    %c0_i32_0 = arith.constant 0 : i32
    %c0_i32_1 = arith.constant 0 : i32
    %c0_i32_2 = arith.constant 0 : i32
    return %c0_i32, %c0_i32_0, %c0_i32_1 : i32, i32, i32
  }
  func.func @transform_2(%arg0: i32) -> (i32, i32) {
    %c0_i32 = arith.constant 0 : i32
    %c0_i32_0 = arith.constant 0 : i32
    %c0_i32_1 = arith.constant 0 : i32
    return %c0_i32, %c0_i32_0 : i32, i32
  }
  func.func @transform_3(%arg0: i32) -> (i32, i32, i32) {
    %c0_i32 = arith.constant 0 : i32
    %c0_i32_0 = arith.constant 0 : i32
    %c0_i32_1 = arith.constant 0 : i32
    return %arg0, %c0_i32, %c0_i32_0 : i32, i32, i32
  }
  func.func @transform_4(%arg0: i32) -> (i32, i32, i32) {
    %c0_i32 = arith.constant 0 : i32
    %c0_i32_0 = arith.constant 0 : i32
    %c0_i32_1 = arith.constant 0 : i32
    return %arg0, %c0_i32, %c0_i32_0 : i32, i32, i32
  }
  func.func @transform_5(%arg0: i32) -> (i32, i32, i32) {
    %c0_i32 = arith.constant 0 : i32
    %c0_i32_0 = arith.constant 0 : i32
    %c0_i32_1 = arith.constant 0 : i32
    return %arg0, %c0_i32, %c0_i32_0 : i32, i32, i32
  }
}

</mosaic_0001>

<bundles_post_ra>
// kernel: tpu_custom_call.1
= control target key start
LH: loop header
LB: loop body
LE: loop exit
PB: predicated region body
PF: predicated region fallthrough
CT: control target
= control target key end

     0   :  { %11 = vsyncpa [#allocation4], 0  ;;  %s1451_s0 = inlined_call_operand.hbm [shape: f32[2,16,64], index: 0, kind: input, shape index: {}]   ;;  %s1452_s1 = inlined_call_operand.hbm [shape: f32[3,64,128], index: 1, kind: input, shape index: {}]   ;;  %s1453_s2 = inlined_call_operand.vmem [shape: f32[1,128], index: 2, kind: input, shape index: {}]   ;;  %s1454_s3 = inlined_call_operand.hbm [shape: f32[2,16,128], index: 3, kind: output, shape index: {0}]   ;;  %s1455_s4 = inlined_call_operand.hbm [shape: f32[2,1,128], index: 4, kind: output, shape index: {1}]   ;;  %s1456_s5 = inlined_call_operand.hbm [shape: f32[2,1,128], index: 5, kind: output, shape index: {2}]  }
   0x1   :  { %13 = vsyncpa [#allocation4 + $0x1], 0 }
   0x2   :  { %14 = vsyncpa [#allocation7], 0 }
   0x3   :  { %15 = vsyncpa [#allocation5], 0 }
   0x4   :  { %17 = vsyncpa [#allocation5 + $0x1], 0 }
   0x5   :  { %18 = vsyncpa [#allocation10], 0 }
   0x6   :  { %20 = vsyncpa [#allocation10 + $0x1], 0  ;;  %s1179_s18 = smov 0   ;;  %s1181_s19 = smov 0  }
   0x7   :  { %s1183_s20 = smov 0   ;;  %s1185_s21 = smov 0  }
   0x8 LB: > { %s1200_s22 = sadd.s32 4294967295, %s1137_s21   ;;  %s1458_s23 = sadd.s32 4294967294, %s1137_s21   ;;  %s1137_s21 = sphi %s1185_s21, %s1482_s21   ;;  %s1133_s20 = sphi %s1183_s20, %s1481_s20   ;;  %s1129_s19 = sphi %s1181_s19, %s1480_s19   ;;  %s1125_s18 = sphi %s1179_s18, %s1479_s18  }
   0x9   : > { %p46_p0 = scmp.ne.s32.totalorder %s1129_s19, %s1125_s18  ;;  %p1457_p1 = scmp.eq.s32.totalorder %s1200_s22, 0 }
   0xa   : > { %p118_p3 = scmp.eq.s32.totalorder %s1458_s23, 1  ;;  %p774_p5 = scmp.ge.s32.totalorder %s1137_s21, 1 }
   0xb   : > { %p1211_p4 = por %p1457_p1, %p46_p0  ;;  %p177_p7 = scmp.lt.s32.totalorder %s1137_s21, 3 }
   0xc   : > { %p1216_p6 = por %p118_p3, %p46_p0  ;;  %s1139_s27 = smov [#allocation6]  }
   0xd   : > { %s1463_s24 = scalar_select %p1211_p4, 1, 0 }
   0xe   : > { %s1464_s25 = scalar_select %p1216_p6, 1, 0 }
   0xf   : > { %p1221_p8 = pnand %p774_p5, %p177_p7  ;;  %s189_s28 = sshll.u32 %s1139_s27, 4  ;;  %s190_s28 = int_to_ptr.vmem [resolvable:$true] %s189_s28 }
  0x10   : > { %s1235_s30 = sadd.s32 1, %s1137_s21   ;;  %s33_s6 = sadd.s32 1, %s1133_s20 }
  0x11   : > { %s1465_s26 = scalar_select %p1221_p8, 1, 0 }
  0x12   : > { %p899_p9 = pneg %p1221_p8  ;;  %s30_s7 = ssub.s32 %s1137_s21, %s1235_s30 }
  0x13   : > { %s970_s8 = scalar_lea.vmem %s190_s28, 3072  ;;  %p978_p5 = scmp.lt.s32.totalorder %s190_s28, %s190_s28 }
  0x14   : > { %p1230_p11 = pnand %p899_p9, %p1457_p1  ;;  %p971_p13 = scmp.ne.s32.totalorder %s190_s28, %s970_s8 }
  0x15   : > { %p979_p7 = scmp.lt.s32.totalorder %s970_s8, %s970_s8 }
  0x16   : > { %p961_p12 = pneg %p1230_p11 }
  0x17   : > { %p980_p10 = por %p979_p7, %p978_p5 }
  0x18   : > { %p973_p0 = pnand %p971_p13, %p961_p12 }
  0x1a   : > { %p974_p3 = pneg %p973_p0 }
  0x1c   : > { %p981_p2 = pnand %p980_p10, %p974_p3 }
  0x1e   : > { %984 = shalt.err (!%p981_p2)
}
  0x1f   : > { %s1459_s9 = smov 128   ;;  %s1141_s10 = smov 8  }
  0x20   : > { %902 = dma.hbm_to_vmem [thread:$0]  (!%p1230_p11), %s1452_s1, 3072, %s190_s28, [#allocation7], %s1459_s9, %s1459_s9, %s1141_s10  }
  0x21   : > { %p31_p2 = scmp.eq.s32.totalorder %s30_s7, 0  ;;  %p40_p9 = scmp.ne.s32.totalorder %s1133_s20, %s1129_s19 }
  0x22   : > { %p41_p10 = scmp.eq.s32.totalorder %s1137_s21, 0  ;;  %p918_p12 = scmp.lt.s32.totalorder %s1137_s21, 2 }
  0x23   : > { %s1255_s13 = scalar_select %p31_p2, %s1133_s20, %s33_s6  }
  0x24   : > { %p42_p13 = por %p41_p10, %p40_p9  ;;  %p1467_p0 = scmp.eq.s32.totalorder %s1200_s22, 1 }
  0x25   : > { %s206_s15 = sand.u32 1, %s1133_s20   ;;  %s798_s16 = sshll.u32 %s1137_s21, 8 }
  0x26   : > { %p1259_p3 = por %p1467_p0, %p40_p9  ;;  %s777_s17 = sshll.u32 %s206_s15, 4 }
  0x27   : > { %s1268_s8 = scalar_lea.hbm %s1451_s0, %s798_s16  ;;  %s210_s28 = scalar_lea.vmem [#allocation3], %s777_s17 }
  0x28   : > { %s1468_s14 = scalar_select %p1259_p3, 1, 0 }
  0x29   : > { %s217_s6 = sshll.u32 %s210_s28, 4  ;;  %p1270_p11 = pnand %p918_p12, %p42_p13  ;;  %s1274_s6 = int_to_ptr.vmem [resolvable:$true] %s217_s6 }
  0x2a   : > { %s1276_s11 = scalar_lea.sflag [#allocation4], %s206_s15  ;;  %s985_s12 = scalar_lea.hbm %s1268_s8, 256 }
  0x2b   : > { %p986_p5 = scmp.ne.s32.totalorder %s1268_s8, %s985_s12  ;;  %p987_p7 = pneg %p1270_p11 }
  0x2c   : > { %s990_s17 = scalar_lea.hbm %s1451_s0, 512  ;;  %p991_p10 = scmp.lt.s32.totalorder %s1268_s8, %s1451_s0 }
  0x2d   : > { %p988_p2 = pnand %p987_p7, %p986_p5  ;;  %p992_p12 = scmp.lt.s32.totalorder %s990_s17, %s985_s12 }
  0x2f   : > { %p989_p9 = pneg %p988_p2  ;;  %p993_p13 = por %p992_p12, %p991_p10 }
  0x31   : > { %p994_p0 = pnand %p993_p13, %p989_p9 }
  0x33   : > { %997 = shalt.err (!%p994_p0)
}
  0x34   : > { %s998_s15 = scalar_lea.vmem %s1274_s6, 256  ;;  %s1142_s23 = smov [#allocation3]  }
  0x35   : > { %p999_p1 = scmp.ne.s32.totalorder %s1274_s6, %s998_s15  ;;  %s1003_s9 = sshll.u32 %s1142_s23, 4  ;;  %s1004_s9 = int_to_ptr.vmem [resolvable:$false] %s1003_s9 }
  0x36   : > { %s1005_s16 = scalar_lea.vmem %s1004_s9, 512  ;;  %p1006_p2 = scmp.lt.s32.totalorder %s1274_s6, %s1004_s9 }
  0x37   : > { %p1001_p6 = pnand %p999_p1, %p987_p7  ;;  %p1007_p3 = scmp.lt.s32.totalorder %s1005_s16, %s998_s15 }
  0x39   : > { %p1002_p5 = pneg %p1001_p6  ;;  %p1008_p4 = por %p1007_p3, %p1006_p2 }
  0x3b   : > { %p1009_p8 = pnand %p1008_p4, %p1002_p5 }
  0x3d   : > { %1012 = shalt.err (!%p1009_p8)
}
  0x3e   : > { %s1470_s12 = smov 128   ;;  %p1471_p1 = scmp.ne.s32.totalorder %s1465_s26, 0 }
  0x3f   : > { %906 = dma.hbm_to_vmem [thread:$0]  (!%p1270_p11), %s1268_s8, 256, %s1274_s6, %s1276_s11, %s1470_s12, %s1470_s12, %s1141_s10  }
  0x40   : > { %229 = sbr.rel (%p1471_p1) target bundleno = 368 (0x170), region = 32  ;;  %s1303_s23 = sand.u32 (!%p1471_p1), 1, %s1129_s19  }
  0x41   : > { %s781_s9 = sshll.u32 (!%p1471_p1), %s1303_s23, 4  ;;  %s232_s27 = scalar_lea.sflag (!%p1471_p1), [#allocation4], %s1303_s23 }
  0x42   : > { %s235_s7 = scalar_lea.vmem (!%p1471_p1), [#allocation3], %s781_s9  ;;  %p1472_p4 = scmp.ne.s32.totalorder (!%p1471_p1), %s1463_s24, 0 }
  0x45   : > { %1108 = dma.done.wait (%p1472_p4), %s232_s27, 256  }
  0x46   : > { %1110 = vsyncadd (%p1472_p4), %s232_s27, 4294967040  ;;  %p1473_p6 = scmp.eq.s32.totalorder %s1200_s22, 0 }
  0x48   : > { %1112 = dma.done.wait (%p1473_p6), [#allocation7], 3072   ;;  %p1474_p8 = pmov %p1473_p6 }
  0x49   : > { %vm274_vm0 = vcmask 523264   ;;  %v1143_v0 = vmov 0.0   ;;  %v303_v1 = vld [vmem:[#allocation6 + $0x78] sm:$0xff]  ;;  %v302_v3 = vld [vmem:[#allocation6 + $0x70] sm:$0xff]  ;;  %v301_v5 = vld [vmem:[#allocation6 + $0x68] sm:$0xff]  ;;  %s261_s10 = scalar_lea.vmem [#allocation8], %s781_s9 }
  0x4a   : > { %1114 = vsyncadd (%p1474_p8), [#allocation7], 4294964224  ;;  %276 = vst.msk [vmem:[#allocation2 + $0x8] sm:$0xff] %vm274_vm0, %v1143_v0  ;;  %v292_v2 = vld [vmem:[#allocation6 + $0x38] sm:$0xff]  ;;  %830 = vmatprep.subr.mxu0 %v303_v1  ;;  %v291_v4 = vld [vmem:[#allocation6 + $0x30] sm:$0xff]  ;;  %s611_s8 = sshll.u32 %s261_s10, 4  ;;  %s1335_s8 = int_to_ptr.vmem [resolvable:$true] %s611_s8 }
  0x4b   : > { %275 = vst.msk [vmem:[#allocation2] sm:$0xff] %vm274_vm0, %v1143_v0  ;;  %277 = vst.msk [vmem:[#allocation2 + $0x10] sm:$0xff] %vm274_vm0, %v1143_v0  ;;  %849 = vmatprep.subr.mxu1 %v292_v2  ;;  %831 = vmatpush3.msra.mxu0 %v303_v1  ;;  %v290_v6 = vld [vmem:[#allocation6 + $0x28] sm:$0xff]  ;;  %v300_v7 = vld [vmem:[#allocation6 + $0x60] sm:$0xff]  ;;  %s799_s6 = sshll.u32 %s1200_s22, 8  ;;  %s590_s28 = scalar_lea.sflag [#allocation5], %s1303_s23 }
  0x4c   : > { %278 = vst.msk [vmem:[#allocation2 + $0x18] sm:$0xff] %vm274_vm0, %v1143_v0  ;;  %850 = vmatpush3.msra.mxu1 %v292_v2  ;;  %832 = vmatprep.subr.mxu0 %v302_v3  ;;  %v289_v8 = vld [vmem:[#allocation6 + $0x20] sm:$0xff]  ;;  %v280_v10 = vld [vmem:[%s235_s7 + $0x8] sm:$0xff]  ;;  %v298_v13 = vld [vmem:[#allocation6 + $0x50] sm:$0xff]  ;;  %s1340_s29 = scalar_lea.hbm %s1454_s3, %s799_s6  ;;  %s1013_s15 = scalar_lea.vmem %s1335_s8, 256 }
  0x4d   : > { %851 = vmatprep.subr.mxu1 %v291_v4  ;;  %833 = vmatpush3.msra.mxu0 %v302_v3  ;;  %v279_v9 = vld [vmem:[%s235_s7] sm:$0xff]  ;;  %v299_v11 = vld [vmem:[#allocation6 + $0x58] sm:$0xff]  ;;  %282 = vst.msk [vmem:[#allocation2 + $0x10] sm:$0xff] %vm274_vm0, %v280_v10  ;;  %v297_v15 = vld [vmem:[#allocation6 + $0x48] sm:$0xff]  ;;  %p1014_p3 = scmp.ne.s32.totalorder %s1335_s8, %s1013_s15  ;;  %p1475_p11 = scmp.ne.s32.totalorder %s1468_s14, 0 }
  0x4e   : > { %852 = vmatpush3.msra.mxu1 %v291_v4  ;;  %834 = vmatprep.subr.mxu0 %v301_v5  ;;  %v288_v12 = vld [vmem:[#allocation6 + $0x18] sm:$0xff]  ;;  %281 = vst.msk [vmem:[#allocation2 + $0x8] sm:$0xff] %vm274_vm0, %v279_v9  ;;  %v287_v14 = vld [vmem:[#allocation6 + $0x10] sm:$0xff]  ;;  %v286_v16 = vld [vmem:[#allocation6 + $0x8] sm:$0xff]  ;;  %s1144_s16 = smov [#allocation8]  }
  0x4f   : > { %853 = vmatprep.subr.mxu1 %v290_v6  ;;  %835 = vmatpush3.msra.mxu0 %v301_v5  ;;  %v296_v17 = vld [vmem:[#allocation6 + $0x40] sm:$0xff]  ;;  %v476_v23 = vld [vmem:[#allocation6 + $0xb8] sm:$0xff]  ;;  %v475_v25 = vld [vmem:[#allocation6 + $0xb0] sm:$0xff]  ;;  %p1015_p7 = pnand %p1014_p3, %p1475_p11  ;;  %s1017_s12 = sshll.u32 %s1144_s16, 4  ;;  %s1018_s12 = int_to_ptr.vmem [resolvable:$false] %s1017_s12 }
  0x50   : > { %854 = vmatpush3.msra.mxu1 %v290_v6  ;;  %836 = vmatprep.subr.mxu0 %v300_v7  ;;  %v285_v18 = vld [vmem:[#allocation6] sm:$0xff]  ;;  %v474_v26 = vld [vmem:[#allocation6 + $0xa8] sm:$0xff]  ;;  %v472_v28 = vld [vmem:[#allocation6 + $0x98] sm:$0xff]  ;;  %s1019_s9 = scalar_lea.vmem %s1018_s12, 512  ;;  %p1020_p10 = scmp.lt.s32.totalorder %s1335_s8, %s1018_s12 }
  0x51   : > { %855 = vmatprep.subr.mxu1 %v289_v8  ;;  %837 = vmatpush3.msra.mxu0 %v300_v7  ;;  %v473_v27 = vld [vmem:[#allocation6 + $0xa0] sm:$0xff]  ;;  %v471_v29 = vld [vmem:[#allocation6 + $0x90] sm:$0xff]  ;;  %v470_v30 = vld [vmem:[#allocation6 + $0x88] sm:$0xff]  ;;  %p1016_p9 = pneg %p1015_p7  ;;  %p1021_p12 = scmp.lt.s32.totalorder %s1019_s9, %s1013_s15 }
  0x52   : > { %856 = vmatpush3.msra.mxu1 %v289_v8  ;;  %838 = vmatprep.subr.mxu0 %v299_v11  ;;  %v469_v31 = vld [vmem:[#allocation6 + $0x80] sm:$0xff] }
  0x53   : > { %857 = vmatprep.subr.mxu1 %v288_v12  ;;  %839 = vmatpush3.msra.mxu0 %v299_v11  ;;  %v790_v39 = vld [vmem:[%s1453_s2] ss:$0 sm:$0xff]  ;;  %p1022_p13 = por %p1021_p12, %p1020_p10 }
  0x54   : > { %858 = vmatpush3.msra.mxu1 %v288_v12  ;;  %840 = vmatprep.subr.mxu0 %v298_v13  ;;  %v294_v21 = vld [vmem:[#allocation2 + $0x10] sm:$0xff] }
  0x55   : > { %859 = vmatprep.subr.mxu1 %v287_v14  ;;  %841 = vmatpush3.msra.mxu0 %v298_v13  ;;  %v293_v19 = vld [vmem:[#allocation2 + $0x8] sm:$0xff]  ;;  %v467_v32 = vld [vmem:[#allocation2 + $0x11] sm:$0xff]  ;;  %p1023_p0 = pnand %p1022_p13, %p1016_p9 }
  0x56   : > { %860 = vmatpush3.msra.mxu1 %v287_v14  ;;  %842 = vmatprep.subr.mxu0 %v297_v15  ;;  %v283_v20 = vld [vmem:[#allocation2 + $0x7] sm:$0xff]  ;;  %v284_v22 = vld [vmem:[#allocation2 + $0xf] sm:$0xff] }
  0x57   : > { %861 = vmatprep.subr.mxu1 %v286_v16  ;;  %843 = vmatpush3.msra.mxu0 %v297_v15  ;;  %v466_v24 = vld [vmem:[#allocation2 + $0x9] sm:$0xff] }
  0x58   : > { %862 = vmatpush3.msra.mxu1 %v286_v16  ;;  %844 = vmatprep.subr.mxu0 %v296_v17 }
  0x59   : > { %863 = vmatprep.subr.mxu1 %v285_v18  ;;  %845 = vmatpush3.msra.mxu0 %v296_v17 }
  0x5a   : > { %846 = vmatprep.mubr.msk.f32.mxu0 %vm274_vm0, %v293_v19  ;;  %864 = vmatpush3.msra.mxu1 %v285_v18 }
  0x5b   : > { %865 = vmatprep.mubr.msk.f32.mxu1 %vm274_vm0, %v283_v20  ;;  %847 = vmatmul.mubr.msk.f32.vlgmr.msra.gmra.mxu0 %vm274_vm0, %v294_v21 }
  0x5c   : > { %866 = vmatmul.mubr.msk.f32.vlgmr.msra.gmra.mxu1 %vm274_vm0, %v284_v22  ;;  %868 = vmatprep.subr.mxu0 %v476_v23 }
  0x5d   : > { %884 = vmatprep.mubr.msk.f32.mxu0 %vm274_vm0, %v466_v24  ;;  %869 = vmatpush3.msra.mxu0 %v476_v23 }
  0x5e   : > { %870 = vmatprep.subr.mxu0 %v475_v25 }
  0x5f   : > { %871 = vmatpush3.msra.mxu0 %v475_v25 }
  0x60   : > { %872 = vmatprep.subr.mxu0 %v474_v26 }
  0x61   : > { %873 = vmatpush3.msra.mxu0 %v474_v26 }
  0x62   : > { %874 = vmatprep.subr.mxu0 %v473_v27 }
  0x63   : > { %875 = vmatpush3.msra.mxu0 %v473_v27 }
  0x64   : > { %876 = vmatprep.subr.mxu0 %v472_v28 }
  0x65   : > { %877 = vmatpush3.msra.mxu0 %v472_v28 }
  0x66   : > { %878 = vmatprep.subr.mxu0 %v471_v29 }
  0x67   : > { %879 = vmatpush3.msra.mxu0 %v471_v29 }
  0x68   : > { %880 = vmatprep.subr.mxu0 %v470_v30 }
  0x69   : > { %881 = vmatpush3.msra.mxu0 %v470_v30 }
  0x6a   : > { %882 = vmatprep.subr.mxu0 %v469_v31 }
  0x6b   : > { %883 = vmatpush3.msra.mxu0 %v469_v31 }
  0x6c   : > { %885 = vmatmul.mubr.msk.f32.vlgmr.msra.gmra.mxu0 %vm274_vm0, %v467_v32 }
 0x11b   : > { %v848_v33 = vpop.f32.mrf.mxu0 }
 0x11c   : > { %v867_v34 = vpop.f32.mrf.mxu1 }
 0x11d   : > { %v376_v35 = vpop.f32.mrf.mxu0  ;;  %v463_v37 = vadd.f32 %v867_v34, %v848_v33 }
 0x11e   : > { %v457_v36 = vpop.f32.mrf.mxu1 }
 0x11f   : > { %v458_v40 = vadd.f32 %v457_v36, %v376_v35 }
 0x12c   : > { %v886_v38 = vpop.f32.mrf.mxu0 }
 0x12d   : > { %v559_v41 = vadd.f32 %v886_v38, %v463_v37 }
 0x12e   : > { %v549_v42 = vpop.f32.mrf.mxu0 }
 0x12f   : > { %v568_v43 = vadd.f32 %v790_v39, %v559_v41  ;;  %v558_v44 = vadd.f32 %v549_v42, %v458_v40 }
 0x131   : > { %570 = vst [vmem:[%s261_s10 + $0x8] sm:$0xff] %v568_v43  ;;  %v567_v45 = vadd.f32 %v790_v39, %v558_v44  ;;  %v580_v46 = vmul.f32 %v568_v43, %v568_v43 }
 0x133   : > { %569 = vst [vmem:[%s261_s10] sm:$0xff] %v567_v45  ;;  %v571_v47 = vadd.f32 %v568_v43, %v567_v45  ;;  %v579_v48 = vmul.f32 %v567_v45, %v567_v45 }
 0x134   : > { %1026 = shalt.err (!%p1023_p0)
}
 0x135   : > { %s1027_s27 = scalar_lea.hbm %s1340_s29, 256  ;;  %s1031_s26 = scalar_lea.hbm %s1454_s3, 512 }
 0x136   : > { %p1028_p5 = scmp.ne.s32.totalorder %s1340_s29, %s1027_s27  ;;  %p1032_p4 = scmp.lt.s32.totalorder %s1340_s29, %s1454_s3 }
 0x137   : > { %p1033_p6 = scmp.lt.s32.totalorder %s1031_s26, %s1027_s27 }
 0x138   : > { %p1029_p2 = pnand %p1028_p5, %p1475_p11 }
 0x139   : > { %p1034_p8 = por %p1033_p6, %p1032_p4 }
 0x13a   : > { %p1030_p1 = pneg %p1029_p2 }
 0x13c   : > { %p1035_p3 = pnand %p1034_p8, %p1030_p1 }
 0x13e   : > { %1038 = shalt.err (!%p1035_p3)
}
 0x13f   : > { %s1145_s11 = smov 128   ;;  %s1146_s17 = smov 8   ;;  %v572_v49 = vrot.slane %v571_v47, 4  ;;  %v581_v50 = vadd.f32 %v580_v46, %v579_v48 }
 0x140   : > { %893 = dma.vmem_to_hbm [thread:$0]  (%p1475_p11), %s1335_s8, 256, %s1340_s29, %s590_s28, %s1145_s11, %s1145_s11, %s1146_s17  }
 0x141   : > { %v573_v51 = vadd.f32 %v572_v49, %v571_v47  ;;  %v582_v52 = vrot.slane %v581_v50, 4  ;;  %s594_s15 = sand.u32 1, %s1200_s22   ;;  %s794_s16 = sshll.u32 %s1200_s22, 4 }
 0x142   : > { %s267_s12 = scalar_lea.vmem [#allocation9], %s1303_s23  ;;  %s273_s27 = scalar_lea.vmem [#allocation11], %s1303_s23 }
 0x143   : > { %v574_v53 = vrot.slane %v573_v51, 2  ;;  %v583_v54 = vadd.f32 %v582_v52, %v581_v50  ;;  %s627_s9 = sshll.u32 %s267_s12, 4  ;;  %s640_s7 = sshll.u32 %s273_s27, 4  ;;  %s1376_s9 = int_to_ptr.vmem [resolvable:$true] %s627_s9  ;;  %s1383_s7 = int_to_ptr.vmem [resolvable:$true] %s640_s7 }
 0x144   : > { %s1374_s28 = scalar_lea.hbm %s1455_s4, %s794_s16  ;;  %s1381_s26 = scalar_lea.hbm %s1456_s5, %s794_s16 }
 0x145   : > { %v575_v55 = vadd.f32 %v574_v53, %v573_v51  ;;  %v584_v56 = vrot.slane %v583_v54, 2  ;;  %s1385_s10 = scalar_lea.sflag [#allocation10], %s594_s15  ;;  %s1039_s6 = scalar_lea.vmem %s1376_s9, 16 }
 0x146   : > { %p1040_p7 = scmp.ne.s32.totalorder %s1376_s9, %s1039_s6  ;;  %s1147_s11 = smov [#allocation9]  }
 0x147   : > { %v585_v57 = vadd.f32 %v584_v56, %v583_v54  ;;  %v576_v58 = vrot.slane %v575_v55, 1  ;;  %s1043_s17 = sshll.u32 %s1147_s11, 4  ;;  %s1044_s17 = int_to_ptr.vmem [resolvable:$false] %s1043_s17 }
 0x148   : > { %p1041_p9 = pnand %p1040_p7, %p1475_p11  ;;  %s1045_s8 = scalar_lea.vmem %s1044_s17, 32 }
 0x149   : > { %v577_v59 = vadd.f32 %v576_v58, %v575_v55  ;;  %v586_v60 = vrot.slane %v585_v57, 1  ;;  %p1046_p12 = scmp.lt.s32.totalorder %s1376_s9, %s1044_s17  ;;  %p1047_p13 = scmp.lt.s32.totalorder %s1045_s8, %s1039_s6 }
 0x14a   : > { %p1042_p10 = pneg %p1041_p9 }
 0x14b   : > { %578 = vst [vmem:[%s267_s12] sm:$0x1] %v577_v59  ;;  %v587_v61 = vadd.f32 %v586_v60, %v585_v57  ;;  %p1048_p0 = por %p1047_p13, %p1046_p12 }
 0x14d   : > { %p1049_p5 = pnand %p1048_p0, %p1042_p10 }
 0x14f   : > { %1052 = shalt.err (!%p1049_p5)
}
 0x150   : > { %s1053_s15 = scalar_lea.hbm %s1374_s28, 16  ;;  %s1057_s29 = scalar_lea.hbm %s1455_s4, 32 }
 0x151   : > { %p1054_p2 = scmp.ne.s32.totalorder %s1374_s28, %s1053_s15  ;;  %p1058_p6 = scmp.lt.s32.totalorder %s1374_s28, %s1455_s4 }
 0x152   : > { %p1059_p8 = scmp.lt.s32.totalorder %s1057_s29, %s1053_s15 }
 0x153   : > { %p1055_p1 = pnand %p1054_p2, %p1475_p11 }
 0x154   : > { %p1060_p3 = por %p1059_p8, %p1058_p6 }
 0x155   : > { %p1056_p4 = pneg %p1055_p1 }
 0x157   : > { %p1061_p7 = pnand %p1060_p3, %p1056_p4 }
 0x159   : > { %1064 = shalt.err (!%p1061_p7)
}
 0x15a   : > { %894 = dma.vmem_to_hbm [thread:$0]  (%p1475_p11), %s1376_s9, 16, %s1374_s28, %s1385_s10   ;;  %588 = vst [vmem:[%s273_s27] sm:$0x1] %v587_v61 }
 0x15b   : > { %s1065_s6 = scalar_lea.vmem %s1383_s7, 16  ;;  %s1148_s11 = smov [#allocation11]  }
 0x15c   : > { %p1066_p9 = scmp.ne.s32.totalorder %s1383_s7, %s1065_s6  ;;  %s1069_s17 = sshll.u32 %s1148_s11, 4  ;;  %s1070_s17 = int_to_ptr.vmem [resolvable:$false] %s1069_s17 }
 0x15d   : > { %s1071_s8 = scalar_lea.vmem %s1070_s17, 32  ;;  %p1072_p13 = scmp.lt.s32.totalorder %s1383_s7, %s1070_s17 }
 0x15e   : > { %p1067_p10 = pnand %p1066_p9, %p1475_p11  ;;  %p1073_p0 = scmp.lt.s32.totalorder %s1071_s8, %s1065_s6 }
 0x160   : > { %p1068_p12 = pneg %p1067_p10  ;;  %p1074_p5 = por %p1073_p0, %p1072_p13 }
 0x162   : > { %p1075_p2 = pnand %p1074_p5, %p1068_p12 }
 0x164   : > { %1078 = shalt.err (!%p1075_p2)
}
 0x165   : > { %s1079_s23 = scalar_lea.hbm %s1381_s26, 16  ;;  %s1083_s28 = scalar_lea.hbm %s1456_s5, 32 }
 0x166   : > { %p1080_p1 = scmp.ne.s32.totalorder %s1381_s26, %s1079_s23  ;;  %p1084_p8 = scmp.lt.s32.totalorder %s1381_s26, %s1456_s5 }
 0x167   : > { %p1085_p3 = scmp.lt.s32.totalorder %s1083_s28, %s1079_s23 }
 0x168   : > { %p1081_p4 = pnand %p1080_p1, %p1475_p11 }
 0x169   : > { %p1086_p7 = por %p1085_p3, %p1084_p8 }
 0x16a   : > { %p1082_p6 = pneg %p1081_p4 }
 0x16c   : > { %p1087_p9 = pnand %p1086_p7, %p1082_p6 }
 0x16e   : > { %1090 = shalt.err (!%p1087_p9)
}
 0x16f   : > { %895 = dma.vmem_to_hbm [thread:$0]  (%p1475_p11), %s1383_s7, 16, %s1381_s26, %s1385_s10  }
 0x170 PF: > { %s652_s12 = sand.u32 1, %s1125_s18   ;;  %p1476_p10 = scmp.ne.s32.totalorder %s1464_s25, 0 }
 0x171   : > { %p1477_p12 = scmp.ge.s32.totalorder %s1137_s21, 2  ;;  %s653_s29 = scalar_lea.sflag [#allocation5], %s652_s12 }
 0x173   : > { %p908_p13 = pnand %p1477_p12, %p1476_p10 }
 0x175   : > { %p909_p0 = pneg %p908_p13 }
 0x177   : > { %1116 = dma.done.wait (%p909_p0), %s653_s29, 256  }
 0x178   : > { %1118 = vsyncadd (%p909_p0), %s653_s29, 4294967040  ;;  %s1478_s22 = sadd.s32 4294967294, %s1137_s21  }
 0x179   : > { %s661_s24 = sand.u32 1, %s1478_s22  }
 0x17a   : > { %s662_s14 = scalar_lea.sflag [#allocation10], %s661_s24 }
 0x17b   : > { %1120 = dma.done.wait (%p909_p0), %s662_s14, 32  }
 0x17c   : > { %1122 = vsyncadd (%p909_p0), %s662_s14, 4294967264  ;;  %p23_p11 = scmp.ge.s32.totalorder %s1235_s30, 4   ;;  %s1479_s18 = smov %s1129_s19 }
 0x17d   : > { %s1480_s19 = smov %s1133_s20  ;;  %s1481_s20 = smov %s1255_s13 }
 0x17e   : > { %s1482_s21 = smov %s1235_s30  ;;  %25 = sbr.rel (!%p23_p11) target bundleno = 8 (0x8), region = 115 }
 0x183   :  { %674 = vsyncpa [#allocation4], 1 }
 0x184   :  { %676 = vsyncpa [#allocation4 + $0x1], 1 }
 0x185   :  { %677 = vsyncpa [#allocation7], 1 }
 0x186   :  { %678 = vsyncpa [#allocation5], 1 }
 0x187   :  { %680 = vsyncpa [#allocation5 + $0x1], 1 }
 0x188   :  { %681 = vsyncpa [#allocation10], 1 }
 0x189   :  { %683 = vsyncpa [#allocation10 + $0x1], 1 }

</bundles_post_ra>
